<compile_context>
chip_gen: v7x
topology: tpu7x:2x2x1
jax: 0.10.0
libtpu: 0.0.40
codegen_flags: <defaults>
</compile_context>

<pallas_src>
import math

import jax
import jax.numpy as jnp
from jax.experimental import pallas as pl
from jax.experimental.pallas import tpu as pltpu


def _cdiv(a, b):
    return -(-a // b)


def _round_up(a, b):
    return _cdiv(a, b) * b


def _tpu_tile_defaults():
    """(target_block_bytes, vmem_limit_bytes) tuned per TPU generation."""
    tile_bytes = 8 * 1024 * 1024           # v5e/v6e: 128 MiB VMEM, amortize step overhead
    vmem_limit = 64 * 1024 * 1024
    try:
        info = pltpu.get_tpu_info()
        vmem_cap = getattr(info, "vmem_capacity_bytes", None)
        if vmem_cap is not None and vmem_cap <= 64 * 1024 * 1024:   # v7x-class: 64 MiB/TC
            tile_bytes = 4 * 1024 * 1024
            vmem_limit = 48 * 1024 * 1024
    except Exception:
        pass
    return tile_bytes, vmem_limit


def _one_hot_kernel_direct(idx_ref, class_ref, o_ref):
    # depth >= 128 (g == 1): class axis already lane-dense, pure int32 compare.
    # idx_ref: (tb, 1) int32; class_ref: (1, depth) int32 (resident constant).
    o_ref[...] = (idx_ref[...] == class_ref[...]).astype(o_ref.dtype)


def _one_hot_kernel_packed(idx_ref, expand_ref, class_ref, o_ref):
    # depth < 128: g indices packed per slab row, w = g*depth lanes.
    # idx_ref: (tb, g) int32; expand_ref: (g, w) bf16 0/1; class_ref: (1, w) f32.
    # idx_rep[r, p] = idx[r, p // depth] via one bf16 MXU matmul (exact for all
    # in-range indices since depth < 128; out-of-range values stay out of range).
    idx_rep = jnp.dot(idx_ref[...].astype(jnp.bfloat16), expand_ref[...],
                      preferred_element_type=jnp.float32)
    o_ref[...] = (idx_rep == class_ref[...]).astype(o_ref.dtype)


def one_hot_encoding(x, depth, float_dtype=jnp.float32, *,
                     target_block_bytes=None, lane_cap=4096):
    """Pallas one-hot: x (...,) index array -> (..., depth) in float_dtype."""
    if depth <= 0:
        raise ValueError("depth must be positive")
    orig_shape = tuple(x.shape)
    n = math.prod(orig_shape) if orig_shape else 1
    out_dtype = jnp.dtype(float_dtype)
    out_itemsize = out_dtype.itemsize
    sub = 8 * max(1, 4 // out_itemsize)      # output-dtype sublane granularity

    default_tile, vmem_limit = _tpu_tile_defaults()
    if target_block_bytes is None:
        target_block_bytes = default_tile

    # ---- lane-packing factor g ------------------------------------------------
    if depth >= 128:
        g = 1
    else:
        g_exact = 128 // math.gcd(depth, 128)      # smallest g with (g*depth) % 128 == 0
        if g_exact * depth <= lane_cap:
            max_m = lane_cap // (g_exact * depth)
            # Prefer a lane-dense g that divides n (no post-kernel slice at all).
            g = next((m * g_exact for m in range(1, max_m + 1)
                      if n % (m * g_exact) == 0), g_exact)
        else:
            g = _cdiv(128, depth)                  # rare awkward depth: masked tail stores
    w = g * depth
    n_rows = _cdiv(n, g)
    n_elems_padded = n_rows * g

    # ---- index prep (tiny) -----------------------------------------------------
    flat = jnp.ravel(x).astype(jnp.int32)          # float -> trunc toward 0, like .to(int64)
    if n_elems_padded != n:
        flat = jnp.pad(flat, (0, n_elems_padded - n))
    idx2d = flat.reshape(n_rows, g)

    # ---- row-tile selection (>= 2 grid steps when big enough, for megacore) ----
    bytes_per_row = w * out_itemsize
    max_tb = max(sub, (target_block_bytes // max(1, bytes_per_row)) // sub * sub)
    if n_rows <= max_tb:
        if n_rows >= 2 * sub:
            tb = _round_up(_cdiv(n_rows, 2), sub)  # split in two -> both TensorCores busy
        else:
            tb = n_rows                            # single block == full dim (always legal)
    else:
        tb = max_tb
    grid = (_cdiv(n_rows, tb),)

    # ---- hoisted constants (DMA'd once, resident across all grid steps) --------
    lane = jnp.arange(w, dtype=jnp.int32)
    if g == 1:
        class_id = lane.reshape(1, w)                                          # int32
        kernel = _one_hot_kernel_direct
        args = (idx2d, class_id)
        in_specs = [pl.BlockSpec((tb, g), lambda i: (i, 0)),
                    pl.BlockSpec((1, w), lambda i: (0, 0))]
        const_bytes = w * 4
        flops = n_rows * w
    else:
        class_id = (lane % depth).astype(jnp.float32).reshape(1, w)            # f32
        expand = (lane[None, :] // depth
                  == jnp.arange(g, dtype=jnp.int32)[:, None]).astype(jnp.bfloat16)
        kernel = _one_hot_kernel_packed
        args = (idx2d, expand, class_id)
        in_specs = [pl.BlockSpec((tb, g), lambda i: (i, 0)),
                    pl.BlockSpec((g, w), lambda i: (0, 0)),
                    pl.BlockSpec((1, w), lambda i: (0, 0))]
        const_bytes = g * w * 2 + w * 4
        flops = 2 * n_rows * g * w + n_rows * w

    cost = pl.CostEstimate(
        flops=flops,
        transcendentals=0,
        bytes_accessed=n_rows * g * 4 + const_bytes + n_rows * w * out_itemsize,
    )

    packed = pl.pallas_call(
        kernel,
        out_shape=jax.ShapeDtypeStruct((n_rows, w), out_dtype),
        grid=grid,
        in_specs=in_specs,
        out_specs=pl.BlockSpec((tb, w), lambda i: (i, 0)),
        compiler_params=pltpu.CompilerParams(
            dimension_semantics=("parallel",),
            vmem_limit_bytes=vmem_limit,
        ),
        cost_estimate=cost,
    )(*args)

    # Free row-major reshape back to (..., depth).
    out = packed.reshape(n_elems_padded, depth)
    if n_elems_padded != n:
        # Only reached when no lane-dense packing factor divides n; g is chosen
        # to make this path rare since the slice re-copies the whole output.
        out = out[:n]
    return out.reshape(*orig_shape, depth)


if __name__ == "__main__":
    key = jax.random.PRNGKey(0)
    k1, k2, k3, k4 = jax.random.split(key, 4)

    # 1) Module-like small case: (B, S) float indices, depth=8 (g=16 divides n -> no slice).
    B, S, DEPTH = 2, 16, 8
    idx1 = jax.random.randint(k1, (B, S), minval=0, maxval=DEPTH)
    x1 = idx1.astype(jnp.float32)                      # module casts to int itself
    out1 = jax.block_until_ready(one_hot_encoding(x1, DEPTH))
    ref1 = jax.nn.one_hot(idx1, DEPTH, dtype=jnp.float32)
    assert out1.shape == (B, S, DEPTH) and out1.dtype == jnp.float32
    assert jnp.array_equal(out1, ref1)

    # 2) Awkward depth (protein-alphabet-like 21): g=128 -> w=2688 (21 full vregs),
    #    n=150 not divisible -> exercises the (rare) slice path.
    idx2 = jax.random.randint(k2, (3, 50), minval=0, maxval=21)
    out2 = jax.block_until_ready(one_hot_encoding(idx2, 21))
    assert jnp.array_equal(out2, jax.nn.one_hot(idx2, 21, dtype=jnp.float32))

    # 3) Multi-block grid + bf16 output (halved HBM writeback bytes).
    idx3 = jax.random.randint(k3, (8, 64), minval=0, maxval=8)
    out3 = jax.block_until_ready(
        one_hot_encoding(idx3.astype(jnp.float32), 8,
                         float_dtype=jnp.bfloat16, target_block_bytes=4096))
    assert jnp.array_equal(out3, jax.nn.one_hot(idx3, 8, dtype=jnp.bfloat16))

    # 4) Large depth (>=128): direct int32-compare path (g == 1), 2-step grid.
    idx4 = jax.random.randint(k4, (2, 8), minval=0, maxval=256)
    out4 = jax.block_until_ready(one_hot_encoding(idx4, 256))
    assert jnp.array_equal(out4, jax.nn.one_hot(idx4, 256, dtype=jnp.float32))

    print("KERNEL_OK")
</pallas_src>

<mosaic_0001>
module attributes {stable_mosaic.version = 11 : i64} {
  func.func @_one_hot_kernel_packed(%arg0: i32, %arg1: memref<2x16xi32, #tpu.memory_space<vmem>>, %arg2: memref<16x128xbf16, #tpu.memory_space<vmem>>, %arg3: memref<1x128xf32, #tpu.memory_space<vmem>>, %arg4: memref<2x128xf32, #tpu.memory_space<vmem>>) attributes {dimension_semantics = [#tpu.dimension_semantics<parallel>], iteration_bounds = array<i64: 1>, scalar_prefetch = 0 : i64, scratch_operands = 0 : i64, tpu.core_type = #tpu.core_type<tc>, window_params = [{transform_indices = @transform_0, window_bounds = array<i64: 2, 16>}, {pipeline_mode = #tpu.pipeline_mode<synchronous>, transform_indices = @transform_1, window_bounds = array<i64: 16, 128>}, {pipeline_mode = #tpu.pipeline_mode<synchronous>, transform_indices = @transform_2, window_bounds = array<i64: 1, 128>}, {transform_indices = @transform_3, window_bounds = array<i64: 2, 128>}]} {
    %c0 = arith.constant 0 : index
    %c0_0 = arith.constant 0 : index
    %0 = vector.load %arg1[%c0, %c0_0] : memref<2x16xi32, #tpu.memory_space<vmem>>, vector<2x16xi32>
    %1 = arith.sitofp %0 : vector<2x16xi32> to vector<2x16xbf16>
    %c0_1 = arith.constant 0 : index
    %c0_2 = arith.constant 0 : index
    %2 = vector.load %arg2[%c0_1, %c0_2] : memref<16x128xbf16, #tpu.memory_space<vmem>>, vector<16x128xbf16>
    %cst = arith.constant dense<0.000000e+00> : vector<2x128xf32>
    %3 = tpu.matmul %1, %2, %cst {dimension_numbers = #tpu.dot_dimension_numbers<[1], [0], [0], [1], [0, 0, 1, 1], [], []>} : vector<2x16xbf16>, vector<16x128xbf16>, vector<2x128xf32> -> vector<2x128xf32>
    %c0_3 = arith.constant 0 : index
    %c0_4 = arith.constant 0 : index
    %4 = vector.load %arg3[%c0_3, %c0_4] : memref<1x128xf32, #tpu.memory_space<vmem>>, vector<1x128xf32>
    %5 = vector.broadcast %4 : vector<1x128xf32> to vector<2x128xf32>
    %6 = arith.cmpf oeq, %3, %5 : vector<2x128xf32>
    %7 = arith.extui %6 : vector<2x128xi1> to vector<2x128xi32>
    %8 = arith.sitofp %7 : vector<2x128xi32> to vector<2x128xf32>
    %c0_5 = arith.constant 0 : index
    %c0_6 = arith.constant 0 : index
    %9 = vector.load %arg4[%c0_5, %c0_6] : memref<2x128xf32, #tpu.memory_space<vmem>>, vector<2x128xf32>
    tpu.vector_store %arg4[%c0_5, %c0_6], %8 {strides = array<i32>} : memref<2x128xf32, #tpu.memory_space<vmem>>, vector<2x128xf32>,
    return
  }
  func.func @transform_0(%arg0: i32) -> (i32, i32) {
    %c0_i32 = arith.constant 0 : i32
    %c0_i32_0 = arith.constant 0 : i32
    return %arg0, %c0_i32 : i32, i32
  }
  func.func @transform_1(%arg0: i32) -> (i32, i32) {
    %c0_i32 = arith.constant 0 : i32
    %c0_i32_0 = arith.constant 0 : i32
    %c0_i32_1 = arith.constant 0 : i32
    return %c0_i32, %c0_i32_0 : i32, i32
  }
  func.func @transform_2(%arg0: i32) -> (i32, i32) {
    %c0_i32 = arith.constant 0 : i32
    %c0_i32_0 = arith.constant 0 : i32
    %c0_i32_1 = arith.constant 0 : i32
    return %c0_i32, %c0_i32_0 : i32, i32
  }
  func.func @transform_3(%arg0: i32) -> (i32, i32) {
    %c0_i32 = arith.constant 0 : i32
    %c0_i32_0 = arith.constant 0 : i32
    return %arg0, %c0_i32 : i32, i32
  }
}

</mosaic_0001>

<bundles_post_ra>
// kernel: tpu_custom_call.1
= control target key start
LH: loop header
LB: loop body
LE: loop exit
PB: predicated region body
PF: predicated region fallthrough
CT: control target
= control target key end

     0   :  { %8 = vsyncpa [#allocation3], 0  ;;  %s326_s0 = inlined_call_operand.hbm [shape: s32[2,16], index: 0, kind: input, shape index: {}]   ;;  %s327_s1 = inlined_call_operand.hbm [shape: bf16[16,128], index: 1, kind: input, shape index: {}]   ;;  %s328_s2 = inlined_call_operand.hbm [shape: f32[1,128], index: 2, kind: input, shape index: {}]   ;;  %s329_s3 = inlined_call_operand.hbm [shape: f32[2,128], index: 3, kind: output, shape index: {}]  }
   0x1   :  { %9 = vsyncpa [#allocation6], 0 }
   0x2   :  { %10 = vsyncpa [#allocation4], 0  ;;  %s250_s12 = smov [#allocation5]   ;;  %s156_s16 = scalar_lea.hbm %s327_s1, 128 }
   0x3   :  { %s26_s13 = sshll.u32 %s250_s12, 4  ;;  %p157_p0 = scmp.ne.s32.totalorder %s327_s1, %s156_s16  ;;  %s27_s13 = int_to_ptr.vmem [resolvable:$true] %s26_s13 }
   0x4   :  { %p160_p1 = scmp.lt.u32.totalorder %s156_s16, %s327_s1 }
   0x6   :  { %p162_p2 = pnand %p160_p1, %p157_p0 }
   0x8   :  { %165 = shalt.err (!%p162_p2)
}
   0x9   :  { %s166_s21 = scalar_lea.vmem %s27_s13, 128  ;;  %p171_p4 = scmp.lt.s32.totalorder %s27_s13, %s27_s13 }
   0xa   :  { %p167_p3 = scmp.ne.s32.totalorder %s27_s13, %s166_s21  ;;  %p172_p5 = scmp.lt.s32.totalorder %s166_s21, %s166_s21 }
   0xc   :  { %p173_p6 = por %p172_p5, %p171_p4 }
   0xe   :  { %p174_p7 = pnand %p173_p6, %p167_p3 }
  0x10   :  { %177 = shalt.err (!%p174_p7)
}
  0x11   :  { %s251_s22 = smov 64   ;;  %s252_s23 = smov 4  }
  0x12   :  { %32 = dma.hbm_to_vmem [thread:$0]  %s327_s1, 128, %s27_s13, [#allocation6], %s251_s22, %s251_s22, %s252_s23  }
  0x13   :  { %s253_s26 = smov [#allocation2]   ;;  %s254_s28 = smov [#allocation7]  }
  0x14   :  { %s17_s27 = sshll.u32 %s253_s26, 4  ;;  %s39_s29 = sshll.u32 %s254_s28, 4  ;;  %s18_s27 = int_to_ptr.vmem [resolvable:$true] %s17_s27  ;;  %s40_s29 = int_to_ptr.vmem [resolvable:$true] %s39_s29 }
  0x15   :  { %s178_s5 = scalar_lea.hbm %s326_s0, 32 }
  0x16   :  { %p179_p8 = scmp.ne.s32.totalorder %s326_s0, %s178_s5  ;;  %p182_p9 = scmp.lt.u32.totalorder %s178_s5, %s326_s0 }
  0x18   :  { %p184_p10 = pnand %p182_p9, %p179_p8 }
  0x1a   :  { %187 = shalt.err (!%p184_p10)
}
  0x1b   :  { %s188_s1 = scalar_lea.vmem %s18_s27, 32  ;;  %p193_p12 = scmp.lt.s32.totalorder %s18_s27, %s18_s27 }
  0x1c   :  { %p189_p11 = scmp.ne.s32.totalorder %s18_s27, %s188_s1  ;;  %p194_p13 = scmp.lt.s32.totalorder %s188_s1, %s188_s1 }
  0x1e   :  { %p195_p0 = por %p194_p13, %p193_p12 }
  0x20   :  { %p196_p1 = pnand %p195_p0, %p189_p11 }
  0x22   :  { %199 = shalt.err (!%p196_p1)
}
  0x23   :  { %20 = dma.hbm_to_vmem [thread:$0]  %s326_s0, 32, %s18_s27, [#allocation3]  }
  0x24   :  { %s200_s14 = scalar_lea.hbm %s328_s2, 16 }
  0x25   :  { %p201_p2 = scmp.ne.s32.totalorder %s328_s2, %s200_s14  ;;  %p204_p3 = scmp.lt.u32.totalorder %s200_s14, %s328_s2 }
  0x27   :  { %p206_p4 = pnand %p204_p3, %p201_p2 }
  0x29   :  { %209 = shalt.err (!%p206_p4)
}
  0x2a   :  { %s210_s19 = scalar_lea.vmem %s40_s29, 16  ;;  %s214_s20 = scalar_lea.vmem %s40_s29, 32 }
  0x2b   :  { %p211_p5 = scmp.ne.s32.totalorder %s40_s29, %s210_s19  ;;  %p215_p6 = scmp.lt.s32.totalorder %s40_s29, %s40_s29 }
  0x2c   :  { %p216_p7 = scmp.lt.s32.totalorder %s214_s20, %s210_s19 }
  0x2e   :  { %p217_p8 = por %p216_p7, %p215_p6 }
  0x30   :  { %p218_p9 = pnand %p217_p8, %p211_p5 }
  0x32   :  { %221 = shalt.err (!%p218_p9)
}
  0x33   :  { %42 = dma.hbm_to_vmem [thread:$0]  %s328_s2, 16, %s40_s29, [#allocation6]  }
  0x34   :  { %244 = dma.done.wait [#allocation3], 32  }
  0x35   :  { %245 = vsyncadd [#allocation3], 4294967264 }
  0x36   :  { %246 = dma.done.wait [#allocation6], 144  }
  0x37   :  { %247 = vsyncadd [#allocation6], 4294967152  ;;  %v255_v0 = vmov 0.0   ;;  %vm256_vm0 = vmmov 0   ;;  %v155_v1 = vld [vmem:[#allocation5] sm:$0xff]   ;;  %vm64_vm1 = vcmask 130048  }
  0x38   :  { %141 = vmatprep.subr.bf16.mxu0 %v255_v0  ;;  %143 = vmatprep.mubr.msk.bf16.mxu0 %vm256_vm0, %v255_v0  ;;  %v53_v2 = vld [vmem:[#allocation2] sm:$0x3]  ;;  %v137_v5 = vld [vmem:[#allocation7] ss:$0 sm:$0xff]  ;;  %s257_s22 = smov [#allocation8]  }
  0x39   :  { %142 = vmatpush3.bf16.msra.mxu0 %v155_v1  ;;  %v54_v3 = vcvt.s32.f32 %v53_v2  ;;  %s125_s23 = sshll.u32 %s257_s22, 4  ;;  %s126_s23 = int_to_ptr.vmem [resolvable:$true] %s125_s23 }
  0x3a   :  { %s222_s2 = scalar_lea.vmem %s126_s23, 32  ;;  %p227_p11 = scmp.lt.s32.totalorder %s126_s23, %s126_s23 }
  0x3b   :  { %v55_v4 = vpack.c.bf16 %v54_v3, %v54_v3  ;;  %p223_p10 = scmp.ne.s32.totalorder %s126_s23, %s222_s2  ;;  %p228_p12 = scmp.lt.s32.totalorder %s222_s2, %s222_s2 }
  0x3d   :  { %144 = vmatmul.mubr.msk.bf16.vlgmr.msra.gmra.mrb[0].mxu0 %vm64_vm1, %v55_v4  ;;  %p229_p13 = por %p228_p12, %p227_p11 }
  0x3f   :  { %p230_p0 = pnand %p229_p13, %p223_p10 }
 0x110   :  { %v102_v6 = vpop.f32.mrb[0].mxu0 }
 0x111   :  { %vm115_vm2 = vcmp.eq.f32.partialorder %v102_v6, %v137_v5  ;;  %v145_v7 = vpop.f32.mrb[1].mxu0 }
 0x112   :  { %v138_v8 = vsel %vm115_vm2, 1.0, %v255_v0  ;;  %v105_v9 = vpop.f32.mrb[2].mxu0 }
 0x113   :  { %118 = vst [vmem:[#allocation8] sm:$0x3] %v138_v8  ;;  %v146_v10 = vpop.f32.mrb[3].mxu0 }
 0x114   :  { %233 = shalt.err (!%p230_p0)
}
 0x115   :  { %s234_s26 = scalar_lea.hbm %s329_s3, 32 }
 0x116   :  { %p235_p1 = scmp.ne.s32.totalorder %s329_s3, %s234_s26  ;;  %p238_p2 = scmp.lt.u32.totalorder %s234_s26, %s329_s3 }
 0x118   :  { %p240_p3 = pnand %p238_p2, %p235_p1 }
 0x11a   :  { %243 = shalt.err (!%p240_p3)
}
 0x11b   :  { %128 = dma.vmem_to_hbm [thread:$0]  %s126_s23, 32, %s329_s3, [#allocation4]  }
 0x11c   :  { %248 = dma.done.wait [#allocation4], 32  }
 0x11d   :  { %249 = vsyncadd [#allocation4], 4294967264 }
 0x11e   :  { %132 = vsyncpa [#allocation3], 1 }
 0x11f   :  { %133 = vsyncpa [#allocation6], 1 }
 0x120   :  { %134 = vsyncpa [#allocation4], 1 }

</bundles_post_ra>
